<compile_context>
chip_gen: v7x
topology: tpu7x:2x2x1
jax: 0.10.0
libtpu: 0.0.40
codegen_flags: <defaults>
</compile_context>

<pallas_src>
import math
from functools import partial

import jax
import jax.numpy as jnp
import numpy as np
from jax import lax
from jax.experimental import pallas as pl
from jax.experimental.pallas import tpu as pltpu


# ----------------------------------------------------------------------------
# Constant band matrices (host-side; they bake in the reflect padding exactly)
# ----------------------------------------------------------------------------
def _reflect_matrix(n, k):
    """R (n+2k, n) with R[i, reflect(i-k)] = 1 (PyTorch/jnp 'reflect' pad)."""
    R = np.zeros((n + 2 * k, n), np.float32)
    for i in range(n + 2 * k):
        j = i - k
        if j < 0:
            j = -j
        elif j >= n:
            j = 2 * (n - 1) - j
        R[i, j] = 1.0
    return R


def _band_matrices(H, W, k):
    RH = _reflect_matrix(H, k)                                    # (H+2k, H)
    RW = _reflect_matrix(W, k)                                    # (W+2k, W)

    d = np.arange(H + 2 * k)[None, :] - np.arange(H)[:, None]     # (H, H+2k)
    A_full = ((d >= 0) & (d <= 2 * k)).astype(np.float32)
    A_top = ((d >= 0) & (d <= k)).astype(np.float32)
    A_bot = ((d >= k) & (d <= 2 * k)).astype(np.float32)

    e = np.arange(W + 2 * k)[:, None] - np.arange(W)[None, :]     # (W+2k, W)
    B_full = ((e >= 0) & (e <= 2 * k)).astype(np.float32)
    B_left = ((e >= 0) & (e <= k)).astype(np.float32)
    B_right = ((e >= k) & (e <= 2 * k)).astype(np.float32)

    # Fold the reflect padding into the bands (exact algebra; entries are small
    # non-negative integers, hence exactly representable in bf16).
    AF, AT, AB = A_full @ RH, A_top @ RH, A_bot @ RH              # (H, H)
    BF, BL, BR = RW.T @ B_full, RW.T @ B_left, RW.T @ B_right     # (W, W)
    return AF, AT, AB, BF, BL, BR


# ----------------------------------------------------------------------------
# Generation-aware tiling heuristics
# ----------------------------------------------------------------------------
def _mxu_row_fill():
    """Rows needed to fill the MXU: 128 on v2-v5, 256 on v6e/v7x."""
    try:
        kind = jax.devices()[0].device_kind.lower()
    except Exception:
        return 256
    return 128 if any(t in kind for t in ("v2", "v3", "v4", "v5")) else 256


def _vmem_capacity_bytes():
    try:
        return int(pltpu.get_tpu_info().vmem_capacity_bytes)
    except Exception:
        return 64 * 1024 * 1024          # v7x per-core size = safe lower bound


def _choose_tiling(B, H, W):
    """Images packed per block: Bh stacked along rows, Bw along lanes."""
    row_target = _mxu_row_fill()
    lane_target = 512

    # Lane packing: make the last dim wide (ideally a multiple of 128 lanes).
    if W % 128 == 0 or W >= lane_target:
        Bw = 1
    else:
        cap = max(1, min(B, lane_target // W))
        Bw = next((c for c in range(cap, 0, -1) if (c * W) % 128 == 0), 0)
        if Bw == 0:   # no 128-multiple reachable: prefer a divisor of B (no pad)
            Bw = next(c for c in range(cap, 0, -1) if B % c == 0)

    # Row packing up to the MXU fill point only (block-diagonal row bands waste
    # MACs linearly in Bh past that).
    avail = max(1, B // Bw)
    Bh = max(1, min(max(1, row_target // H), avail))
    if B % Bw == 0:   # snap to a divisor so the batch needs no zero-padding
        Bh = next(c for c in range(Bh, 0, -1) if avail % c == 0)

    # Keep >= 2 grid steps when the batch allows (v7x has 2 TensorCores; the
    # "parallel" grid axis only helps with >= 2 steps).
    while Bh * Bw >= B and Bh * Bw > 1:
        if Bh > 1:
            Bh -= 1
        else:
            Bw -= 1
    return Bh, Bw


# ----------------------------------------------------------------------------
# Kernel
# ----------------------------------------------------------------------------
def _split3(a):
    """f32 -> three bf16 terms (a ~= a0+a1+a2, residual <= ~2^-26 relative)."""
    a0 = a.astype(jnp.bfloat16)
    r = a - a0.astype(jnp.float32)
    a1 = r.astype(jnp.bfloat16)
    r = r - a1.astype(jnp.float32)
    a2 = r.astype(jnp.bfloat16)
    return a0, a1, a2


def _hog_kernel(af_ref, atb_ref, bf_ref, blr_ref, x_ref, o_ref, *, c, rows, cols):
    """One block = a (Bh x Bw) grid of images packed as (rows, cols)=(Bh*H, Bw*W)."""
    x = x_ref[...]                                    # (rows, cols) f32
    af, atb = af_ref[...], atb_ref[...]               # bf16 bands (exact small ints)
    bf, blr = bf_ref[...], blr_ref[...]

    dot = partial(jnp.dot, preferred_element_type=jnp.float32)

    # 3-term bf16 split of the data operand; bands are exact in bf16 -> 3 MXU
    # passes per matmul with ~f32 accuracy (vs. 6 for Precision.HIGHEST).
    x0, x1, x2 = _split3(x)
    u = dot(af, x0) + dot(af, x1) + dot(af, x2)       # full (2k+1)-row window sums
    v = dot(x0, bf) + dot(x1, bf) + dot(x2, bf)       # full (2k+1)-col window sums

    # Fused half-window products (4 matmuls total instead of 6).
    u0, u1, u2 = _split3(u)
    gx12 = dot(u0, blr) + dot(u1, blr) + dot(u2, blr)   # (rows, 2*cols): [M11 | M21]
    v0, v1, v2 = _split3(v)
    gy12 = dot(atb, v0) + dot(atb, v1) + dot(atb, v2)   # (2*rows, cols): [M13 ; M23]

    gx1 = gx12[:, :cols] + c
    gx2 = gx12[:, cols:] + c
    gy1 = gy12[:rows, :] + c
    gy2 = gy12[rows:, :] + c

    # log(a/b) = log a - log b: logs go to the EUP slot, no VALU divide.
    gx = jnp.log(gx1) - jnp.log(gx2)
    gy = jnp.log(gy1) - jnp.log(gy2)
    o_ref[...] = jnp.sqrt(gx * gx + gy * gy)


# ----------------------------------------------------------------------------
# Wrapper
# ----------------------------------------------------------------------------
def sar_hog_forward(x, *, k=5):
    """x: (B, 1, H, W) float32 (NCHW).  Returns (B, 1, H, W) float32."""
    B, C, H, W = x.shape
    assert C == 1, "SAR_HOGLayerC conv weights have in_channels=1"
    assert k < H and k < W, "reflect padding requires k < spatial dims"

    Bh, Bw = _choose_tiling(B, H, W)
    # Rows of a strict sub-block must be a multiple of the 8-row sublane tile.
    if (Bh * H) % 8 != 0 and Bh * Bw < B:
        g = 8 // math.gcd(H, 8)
        Bh = -(-Bh // g) * g
    Bt = Bh * Bw
    G = -(-B // Bt)
    B_pad = G * Bt
    R, Wb = Bh * H, Bw * W

    # Constant band matrices (reflect pad folded in; exact in bf16).
    AF, AT, AB, BF, BL, BR = _band_matrices(H, W, k)
    eh, ew = np.eye(Bh, dtype=np.float32), np.eye(Bw, dtype=np.float32)
    AFb = jnp.asarray(np.kron(eh, AF), jnp.bfloat16)                           # (R, R)
    ATBb = jnp.asarray(np.concatenate([np.kron(eh, AT), np.kron(eh, AB)], 0),
                       jnp.bfloat16)                                           # (2R, R)
    BFb = jnp.asarray(np.kron(ew, BF), jnp.bfloat16)                           # (Wb, Wb)
    BLRb = jnp.asarray(np.concatenate([np.kron(ew, BL), np.kron(ew, BR)], 1),
                       jnp.bfloat16)                                           # (Wb, 2Wb)
    c = 0.01 * (2 * k + 1) * (k + 1)   # fused "+0.01" (same #ones in all 4 masks)

    # Lay the input out as G blocks, each a (Bh x Bw) lane-dense image grid.
    x3 = x[:, 0].astype(jnp.float32)
    if B_pad != B:
        # Zero batch-pad (rare: tiling snaps to divisors of B when it can);
        # padded rows give log(c/c) = 0 and are sliced off.
        x3 = jnp.pad(x3, ((0, B_pad - B), (0, 0), (0, 0)))
    x2d = jnp.transpose(x3.reshape(G, Bh, Bw, H, W),
                        (0, 1, 3, 2, 4)).reshape(G * R, Wb)   # free when Bw == 1

    # VMEM budget from the real block footprint and the chip's VMEM capacity.
    band_bytes = 2 * (3 * R * R + 3 * Wb * Wb)          # bf16 constants
    io_bytes = 2 * 2 * (R * Wb * 4)                      # x + out, double-buffered
    scratch_bytes = 80 * R * Wb                          # in-kernel temporaries
    need = 2 * band_bytes + io_bytes + scratch_bytes + (4 << 20)
    vmem_limit = int(min(max(need, 32 << 20), int(0.75 * _vmem_capacity_bytes())))

    cost = pl.CostEstimate(
        flops=int(G * 3 * (6 * R * R * Wb + 6 * R * Wb * Wb)),
        transcendentals=int(5 * B_pad * H * W),
        bytes_accessed=int(4 * 2 * B_pad * H * W + 2 * (3 * R * R + 3 * Wb * Wb)),
    )

    def make_call(single_buffer_bands):
        def band_spec(shape):
            kw = {"pipeline_mode": pl.Buffered(1)} if single_buffer_bands else {}
            return pl.BlockSpec(shape, lambda i: (0, 0), **kw)
        return pl.pallas_call(
            partial(_hog_kernel, c=float(c), rows=R, cols=Wb),
            out_shape=jax.ShapeDtypeStruct((G * R, Wb), jnp.float32),
            grid_spec=pltpu.PrefetchScalarGridSpec(
                num_scalar_prefetch=0,
                grid=(G,),
                in_specs=[band_spec((R, R)),          # AF
                          band_spec((2 * R, R)),      # [AT ; AB]
                          band_spec((Wb, Wb)),        # BF
                          band_spec((Wb, 2 * Wb)),    # [BL | BR]
                          pl.BlockSpec((R, Wb), lambda i: (i, 0))],
                out_specs=pl.BlockSpec((R, Wb), lambda i: (i, 0)),
            ),
            compiler_params=pltpu.CompilerParams(
                dimension_semantics=("parallel",),
                vmem_limit_bytes=vmem_limit,
            ),
            cost_estimate=cost,
        )

    try:
        out2d = make_call(True)(AFb, ATBb, BFb, BLRb, x2d)
    except Exception:
        # pl.Buffered(1) is purely a VMEM optimization for the constant bands;
        # fall back to default double-buffering if this build rejects it.
        out2d = make_call(False)(AFb, ATBb, BFb, BLRb, x2d)

    out = jnp.transpose(out2d.reshape(G, Bh, H, Bw, W),
                        (0, 1, 3, 2, 4)).reshape(B_pad, H, W)[:B]
    return out[:, None, :, :]


# ----------------------------------------------------------------------------
# Pure-JAX reference mirroring the PyTorch module literally
# ----------------------------------------------------------------------------
def _reference(x, k=5):
    r = k
    M13 = np.concatenate([np.ones((r + 1, 2 * r + 1)), np.zeros((r, 2 * r + 1))], axis=0)
    M23 = np.concatenate([np.zeros((r, 2 * r + 1)), np.ones((r + 1, 2 * r + 1))], axis=0)
    M11 = np.concatenate([np.ones((2 * r + 1, r + 1)), np.zeros((2 * r + 1, r))], axis=1)
    M21 = np.concatenate([np.zeros((2 * r + 1, r)), np.ones((2 * r + 1, r + 1))], axis=1)

    xp = jnp.pad(x.astype(jnp.float32),
                 ((0, 0), (0, 0), (k, k), (k, k)), mode="reflect") + 0.01

    def conv(w):
        w = jnp.asarray(w, jnp.float32)[None, None]   # (O=1, I=1, kh, kw)
        return lax.conv_general_dilated(
            xp, w, window_strides=(1, 1), padding="VALID",
            precision=lax.Precision.HIGHEST)

    gx = jnp.log(conv(M11) / conv(M21))
    gy = jnp.log(conv(M13) / conv(M23))
    return jnp.sqrt(gx * gx + gy * gy)


if __name__ == "__main__":
    key = jax.random.PRNGKey(0)
    B, C, H, W = 2, 1, 16, 16
    k = 5
    # Positive inputs (SAR intensities); deterministic.
    x = jax.random.uniform(key, (B, C, H, W), jnp.float32, minval=0.1, maxval=1.0)

    out = jax.block_until_ready(sar_hog_forward(x, k=k))
    ref = jax.block_until_ready(_reference(x, k=k))

    np.testing.assert_allclose(np.asarray(out), np.asarray(ref),
                               rtol=1e-4, atol=2e-5)
    assert out.shape == (B, 1, H, W) and out.dtype == jnp.float32

    print("KERNEL_OK")
</pallas_src>

<mosaic_0001>
module attributes {stable_mosaic.version = 11 : i64} {
  func.func @_hog_kernel(%arg0: i32, %arg1: memref<16x16xbf16, #tpu.memory_space<vmem>>, %arg2: memref<32x16xbf16, #tpu.memory_space<vmem>>, %arg3: memref<16x16xbf16, #tpu.memory_space<vmem>>, %arg4: memref<16x32xbf16, #tpu.memory_space<vmem>>, %arg5: memref<16x16xf32, #tpu.memory_space<vmem>>, %arg6: memref<16x16xf32, #tpu.memory_space<vmem>>) attributes {dimension_semantics = [#tpu.dimension_semantics<parallel>], iteration_bounds = array<i64: 2>, scalar_prefetch = 0 : i64, scratch_operands = 0 : i64, tpu.core_type = #tpu.core_type<tc>, window_params = [{pipeline_mode = #tpu.pipeline_mode<synchronous>, transform_indices = @transform_0, window_bounds = array<i64: 16, 16>}, {pipeline_mode = #tpu.pipeline_mode<synchronous>, transform_indices = @transform_1, window_bounds = array<i64: 32, 16>}, {pipeline_mode = #tpu.pipeline_mode<synchronous>, transform_indices = @transform_2, window_bounds = array<i64: 16, 16>}, {pipeline_mode = #tpu.pipeline_mode<synchronous>, transform_indices = @transform_3, window_bounds = array<i64: 16, 32>}, {transform_indices = @transform_4, window_bounds = array<i64: 16, 16>}, {transform_indices = @transform_5, window_bounds = array<i64: 16, 16>}]} {
    %c0 = arith.constant 0 : index
    %c0_0 = arith.constant 0 : index
    %0 = vector.load %arg5[%c0, %c0_0] : memref<16x16xf32, #tpu.memory_space<vmem>>, vector<16x16xf32>
    %c0_1 = arith.constant 0 : index
    %c0_2 = arith.constant 0 : index
    %1 = vector.load %arg1[%c0_1, %c0_2] : memref<16x16xbf16, #tpu.memory_space<vmem>>, vector<16x16xbf16>
    %c0_3 = arith.constant 0 : index
    %c0_4 = arith.constant 0 : index
    %2 = vector.load %arg2[%c0_3, %c0_4] : memref<32x16xbf16, #tpu.memory_space<vmem>>, vector<32x16xbf16>
    %c0_5 = arith.constant 0 : index
    %c0_6 = arith.constant 0 : index
    %3 = vector.load %arg3[%c0_5, %c0_6] : memref<16x16xbf16, #tpu.memory_space<vmem>>, vector<16x16xbf16>
    %c0_7 = arith.constant 0 : index
    %c0_8 = arith.constant 0 : index
    %4 = vector.load %arg4[%c0_7, %c0_8] : memref<16x32xbf16, #tpu.memory_space<vmem>>, vector<16x32xbf16>
    %5 = arith.truncf %0 : vector<16x16xf32> to vector<16x16xbf16>
    %6 = arith.extf %5 : vector<16x16xbf16> to vector<16x16xf32>
    %7 = arith.subf %0, %6 : vector<16x16xf32>
    %8 = arith.truncf %7 : vector<16x16xf32> to vector<16x16xbf16>
    %9 = arith.extf %8 : vector<16x16xbf16> to vector<16x16xf32>
    %10 = arith.subf %7, %9 : vector<16x16xf32>
    %11 = arith.truncf %10 : vector<16x16xf32> to vector<16x16xbf16>
    %cst = arith.constant dense<0.000000e+00> : vector<16x16xf32>
    %12 = tpu.matmul %1, %5, %cst {dimension_numbers = #tpu.dot_dimension_numbers<[1], [0], [0], [1], [0, 0, 1, 1], [], []>} : vector<16x16xbf16>, vector<16x16xbf16>, vector<16x16xf32> -> vector<16x16xf32>
    %cst_9 = arith.constant dense<0.000000e+00> : vector<16x16xf32>
    %13 = tpu.matmul %1, %8, %cst_9 {dimension_numbers = #tpu.dot_dimension_numbers<[1], [0], [0], [1], [0, 0, 1, 1], [], []>} : vector<16x16xbf16>, vector<16x16xbf16>, vector<16x16xf32> -> vector<16x16xf32>
    %14 = arith.addf %12, %13 : vector<16x16xf32>
    %cst_10 = arith.constant dense<0.000000e+00> : vector<16x16xf32>
    %15 = tpu.matmul %1, %11, %cst_10 {dimension_numbers = #tpu.dot_dimension_numbers<[1], [0], [0], [1], [0, 0, 1, 1], [], []>} : vector<16x16xbf16>, vector<16x16xbf16>, vector<16x16xf32> -> vector<16x16xf32>
    %16 = arith.addf %14, %15 : vector<16x16xf32>
    %cst_11 = arith.constant dense<0.000000e+00> : vector<16x16xf32>
    %17 = tpu.matmul %5, %3, %cst_11 {dimension_numbers = #tpu.dot_dimension_numbers<[1], [0], [0], [1], [0, 0, 1, 1], [], []>} : vector<16x16xbf16>, vector<16x16xbf16>, vector<16x16xf32> -> vector<16x16xf32>
    %cst_12 = arith.constant dense<0.000000e+00> : vector<16x16xf32>
    %18 = tpu.matmul %8, %3, %cst_12 {dimension_numbers = #tpu.dot_dimension_numbers<[1], [0], [0], [1], [0, 0, 1, 1], [], []>} : vector<16x16xbf16>, vector<16x16xbf16>, vector<16x16xf32> -> vector<16x16xf32>
    %19 = arith.addf %17, %18 : vector<16x16xf32>
    %cst_13 = arith.constant dense<0.000000e+00> : vector<16x16xf32>
    %20 = tpu.matmul %11, %3, %cst_13 {dimension_numbers = #tpu.dot_dimension_numbers<[1], [0], [0], [1], [0, 0, 1, 1], [], []>} : vector<16x16xbf16>, vector<16x16xbf16>, vector<16x16xf32> -> vector<16x16xf32>
    %21 = arith.addf %19, %20 : vector<16x16xf32>
    %22 = arith.truncf %16 : vector<16x16xf32> to vector<16x16xbf16>
    %23 = arith.extf %22 : vector<16x16xbf16> to vector<16x16xf32>
    %24 = arith.subf %16, %23 : vector<16x16xf32>
    %25 = arith.truncf %24 : vector<16x16xf32> to vector<16x16xbf16>
    %26 = arith.extf %25 : vector<16x16xbf16> to vector<16x16xf32>
    %27 = arith.subf %24, %26 : vector<16x16xf32>
    %28 = arith.truncf %27 : vector<16x16xf32> to vector<16x16xbf16>
    %cst_14 = arith.constant dense<0.000000e+00> : vector<16x32xf32>
    %29 = tpu.matmul %22, %4, %cst_14 {dimension_numbers = #tpu.dot_dimension_numbers<[1], [0], [0], [1], [0, 0, 1, 1], [], []>} : vector<16x16xbf16>, vector<16x32xbf16>, vector<16x32xf32> -> vector<16x32xf32>
    %cst_15 = arith.constant dense<0.000000e+00> : vector<16x32xf32>
    %30 = tpu.matmul %25, %4, %cst_15 {dimension_numbers = #tpu.dot_dimension_numbers<[1], [0], [0], [1], [0, 0, 1, 1], [], []>} : vector<16x16xbf16>, vector<16x32xbf16>, vector<16x32xf32> -> vector<16x32xf32>
    %31 = arith.addf %29, %30 : vector<16x32xf32>
    %cst_16 = arith.constant dense<0.000000e+00> : vector<16x32xf32>
    %32 = tpu.matmul %28, %4, %cst_16 {dimension_numbers = #tpu.dot_dimension_numbers<[1], [0], [0], [1], [0, 0, 1, 1], [], []>} : vector<16x16xbf16>, vector<16x32xbf16>, vector<16x32xf32> -> vector<16x32xf32>
    %33 = arith.addf %31, %32 : vector<16x32xf32>
    %34 = arith.truncf %21 : vector<16x16xf32> to vector<16x16xbf16>
    %35 = arith.extf %34 : vector<16x16xbf16> to vector<16x16xf32>
    %36 = arith.subf %21, %35 : vector<16x16xf32>
    %37 = arith.truncf %36 : vector<16x16xf32> to vector<16x16xbf16>
    %38 = arith.extf %37 : vector<16x16xbf16> to vector<16x16xf32>
    %39 = arith.subf %36, %38 : vector<16x16xf32>
    %40 = arith.truncf %39 : vector<16x16xf32> to vector<16x16xbf16>
    %cst_17 = arith.constant dense<0.000000e+00> : vector<32x16xf32>
    %41 = tpu.matmul %2, %34, %cst_17 {dimension_numbers = #tpu.dot_dimension_numbers<[1], [0], [0], [1], [0, 0, 1, 1], [], []>} : vector<32x16xbf16>, vector<16x16xbf16>, vector<32x16xf32> -> vector<32x16xf32>
    %cst_18 = arith.constant dense<0.000000e+00> : vector<32x16xf32>
    %42 = tpu.matmul %2, %37, %cst_18 {dimension_numbers = #tpu.dot_dimension_numbers<[1], [0], [0], [1], [0, 0, 1, 1], [], []>} : vector<32x16xbf16>, vector<16x16xbf16>, vector<32x16xf32> -> vector<32x16xf32>
    %43 = arith.addf %41, %42 : vector<32x16xf32>
    %cst_19 = arith.constant dense<0.000000e+00> : vector<32x16xf32>
    %44 = tpu.matmul %2, %40, %cst_19 {dimension_numbers = #tpu.dot_dimension_numbers<[1], [0], [0], [1], [0, 0, 1, 1], [], []>} : vector<32x16xbf16>, vector<16x16xbf16>, vector<32x16xf32> -> vector<32x16xf32>
    %45 = arith.addf %43, %44 : vector<32x16xf32>
    %46 = vector.extract_strided_slice %33 {offsets = [0, 0], sizes = [16, 16], strides = [1, 1]} : vector<16x32xf32> to vector<16x16xf32>
    %cst_20 = arith.constant 6.600000e-01 : f32
    %47 = vector.broadcast %cst_20 : f32 to vector<16x16xf32>
    %48 = arith.addf %46, %47 : vector<16x16xf32>
    %49 = vector.extract_strided_slice %33 {offsets = [0, 16], sizes = [16, 16], strides = [1, 1]} : vector<16x32xf32> to vector<16x16xf32>
    %cst_21 = arith.constant 6.600000e-01 : f32
    %50 = vector.broadcast %cst_21 : f32 to vector<16x16xf32>
    %51 = arith.addf %49, %50 : vector<16x16xf32>
    %52 = vector.extract_strided_slice %45 {offsets = [0, 0], sizes = [16, 16], strides = [1, 1]} : vector<32x16xf32> to vector<16x16xf32>
    %cst_22 = arith.constant 6.600000e-01 : f32
    %53 = vector.broadcast %cst_22 : f32 to vector<16x16xf32>
    %54 = arith.addf %52, %53 : vector<16x16xf32>
    %55 = vector.extract_strided_slice %45 {offsets = [16, 0], sizes = [16, 16], strides = [1, 1]} : vector<32x16xf32> to vector<16x16xf32>
    %cst_23 = arith.constant 6.600000e-01 : f32
    %56 = vector.broadcast %cst_23 : f32 to vector<16x16xf32>
    %57 = arith.addf %55, %56 : vector<16x16xf32>
    %58 = math.log %48 : vector<16x16xf32>
    %59 = math.log %51 : vector<16x16xf32>
    %60 = arith.subf %58, %59 : vector<16x16xf32>
    %61 = math.log %54 : vector<16x16xf32>
    %62 = math.log %57 : vector<16x16xf32>
    %63 = arith.subf %61, %62 : vector<16x16xf32>
    %64 = arith.mulf %60, %60 : vector<16x16xf32>
    %65 = arith.mulf %63, %63 : vector<16x16xf32>
    %66 = arith.addf %64, %65 : vector<16x16xf32>
    %67 = math.sqrt %66 : vector<16x16xf32>
    %c0_24 = arith.constant 0 : index
    %c0_25 = arith.constant 0 : index
    %68 = vector.load %arg6[%c0_24, %c0_25] : memref<16x16xf32, #tpu.memory_space<vmem>>, vector<16x16xf32>
    tpu.vector_store %arg6[%c0_24, %c0_25], %67 {strides = array<i32>} : memref<16x16xf32, #tpu.memory_space<vmem>>, vector<16x16xf32>,
    return
  }
  func.func @transform_0(%arg0: i32) -> (i32, i32) {
    %c0_i32 = arith.constant 0 : i32
    %c0_i32_0 = arith.constant 0 : i32
    %c0_i32_1 = arith.constant 0 : i32
    return %c0_i32, %c0_i32_0 : i32, i32
  }
  func.func @transform_1(%arg0: i32) -> (i32, i32) {
    %c0_i32 = arith.constant 0 : i32
    %c0_i32_0 = arith.constant 0 : i32
    %c0_i32_1 = arith.constant 0 : i32
    return %c0_i32, %c0_i32_0 : i32, i32
  }
  func.func @transform_2(%arg0: i32) -> (i32, i32) {
    %c0_i32 = arith.constant 0 : i32
    %c0_i32_0 = arith.constant 0 : i32
    %c0_i32_1 = arith.constant 0 : i32
    return %c0_i32, %c0_i32_0 : i32, i32
  }
  func.func @transform_3(%arg0: i32) -> (i32, i32) {
    %c0_i32 = arith.constant 0 : i32
    %c0_i32_0 = arith.constant 0 : i32
    %c0_i32_1 = arith.constant 0 : i32
    return %c0_i32, %c0_i32_0 : i32, i32
  }
  func.func @transform_4(%arg0: i32) -> (i32, i32) {
    %c0_i32 = arith.constant 0 : i32
    %c0_i32_0 = arith.constant 0 : i32
    return %arg0, %c0_i32 : i32, i32
  }
  func.func @transform_5(%arg0: i32) -> (i32, i32) {
    %c0_i32 = arith.constant 0 : i32
    %c0_i32_0 = arith.constant 0 : i32
    return %arg0, %c0_i32 : i32, i32
  }
}

module attributes {stable_mosaic.version = 11 : i64} {
  func.func @_hog_kernel(%arg0: i32, %arg1: memref<16x16xbf16, #tpu.memory_space<vmem>>, %arg2: memref<32x16xbf16, #tpu.memory_space<vmem>>, %arg3: memref<16x16xbf16, #tpu.memory_space<vmem>>, %arg4: memref<16x32xbf16, #tpu.memory_space<vmem>>, %arg5: memref<16x16xf32, #tpu.memory_space<vmem>>, %arg6: memref<16x16xf32, #tpu.memory_space<vmem>>) attributes {dimension_semantics = [#tpu.dimension_semantics<parallel>], iteration_bounds = array<i64: 2>, scalar_prefetch = 0 : i64, scratch_operands = 0 : i64, tpu.core_type = #tpu.core_type<tc>, window_params = [{pipeline_mode = #tpu.pipeline_mode<synchronous>, transform_indices = @transform_0, window_bounds = array<i64: 16, 16>}, {pipeline_mode = #tpu.pipeline_mode<synchronous>, transform_indices = @transform_1, window_bounds = array<i64: 32, 16>}, {pipeline_mode = #tpu.pipeline_mode<synchronous>, transform_indices = @transform_2, window_bounds = array<i64: 16, 16>}, {pipeline_mode = #tpu.pipeline_mode<synchronous>, transform_indices = @transform_3, window_bounds = array<i64: 16, 32>}, {transform_indices = @transform_4, window_bounds = array<i64: 16, 16>}, {transform_indices = @transform_5, window_bounds = array<i64: 16, 16>}]} {
    %c0 = arith.constant 0 : index
    %c0_0 = arith.constant 0 : index
    %0 = vector.load %arg5[%c0, %c0_0] : memref<16x16xf32, #tpu.memory_space<vmem>>, vector<16x16xf32>
    %c0_1 = arith.constant 0 : index
    %c0_2 = arith.constant 0 : index
    %1 = vector.load %arg1[%c0_1, %c0_2] : memref<16x16xbf16, #tpu.memory_space<vmem>>, vector<16x16xbf16>
    %c0_3 = arith.constant 0 : index
    %c0_4 = arith.constant 0 : index
    %2 = vector.load %arg2[%c0_3, %c0_4] : memref<32x16xbf16, #tpu.memory_space<vmem>>, vector<32x16xbf16>
    %c0_5 = arith.constant 0 : index
    %c0_6 = arith.constant 0 : index
    %3 = vector.load %arg3[%c0_5, %c0_6] : memref<16x16xbf16, #tpu.memory_space<vmem>>, vector<16x16xbf16>
    %c0_7 = arith.constant 0 : index
    %c0_8 = arith.constant 0 : index
    %4 = vector.load %arg4[%c0_7, %c0_8] : memref<16x32xbf16, #tpu.memory_space<vmem>>, vector<16x32xbf16>
    %5 = arith.truncf %0 : vector<16x16xf32> to vector<16x16xbf16>
    %6 = arith.extf %5 : vector<16x16xbf16> to vector<16x16xf32>
    %7 = arith.subf %0, %6 : vector<16x16xf32>
    %8 = arith.truncf %7 : vector<16x16xf32> to vector<16x16xbf16>
    %9 = arith.extf %8 : vector<16x16xbf16> to vector<16x16xf32>
    %10 = arith.subf %7, %9 : vector<16x16xf32>
    %11 = arith.truncf %10 : vector<16x16xf32> to vector<16x16xbf16>
    %cst = arith.constant dense<0.000000e+00> : vector<16x16xf32>
    %12 = tpu.matmul %1, %5, %cst {dimension_numbers = #tpu.dot_dimension_numbers<[1], [0], [0], [1], [0, 0, 1, 1], [], []>} : vector<16x16xbf16>, vector<16x16xbf16>, vector<16x16xf32> -> vector<16x16xf32>
    %cst_9 = arith.constant dense<0.000000e+00> : vector<16x16xf32>
    %13 = tpu.matmul %1, %8, %cst_9 {dimension_numbers = #tpu.dot_dimension_numbers<[1], [0], [0], [1], [0, 0, 1, 1], [], []>} : vector<16x16xbf16>, vector<16x16xbf16>, vector<16x16xf32> -> vector<16x16xf32>
    %14 = arith.addf %12, %13 : vector<16x16xf32>
    %cst_10 = arith.constant dense<0.000000e+00> : vector<16x16xf32>
    %15 = tpu.matmul %1, %11, %cst_10 {dimension_numbers = #tpu.dot_dimension_numbers<[1], [0], [0], [1], [0, 0, 1, 1], [], []>} : vector<16x16xbf16>, vector<16x16xbf16>, vector<16x16xf32> -> vector<16x16xf32>
    %16 = arith.addf %14, %15 : vector<16x16xf32>
    %cst_11 = arith.constant dense<0.000000e+00> : vector<16x16xf32>
    %17 = tpu.matmul %5, %3, %cst_11 {dimension_numbers = #tpu.dot_dimension_numbers<[1], [0], [0], [1], [0, 0, 1, 1], [], []>} : vector<16x16xbf16>, vector<16x16xbf16>, vector<16x16xf32> -> vector<16x16xf32>
    %cst_12 = arith.constant dense<0.000000e+00> : vector<16x16xf32>
    %18 = tpu.matmul %8, %3, %cst_12 {dimension_numbers = #tpu.dot_dimension_numbers<[1], [0], [0], [1], [0, 0, 1, 1], [], []>} : vector<16x16xbf16>, vector<16x16xbf16>, vector<16x16xf32> -> vector<16x16xf32>
    %19 = arith.addf %17, %18 : vector<16x16xf32>
    %cst_13 = arith.constant dense<0.000000e+00> : vector<16x16xf32>
    %20 = tpu.matmul %11, %3, %cst_13 {dimension_numbers = #tpu.dot_dimension_numbers<[1], [0], [0], [1], [0, 0, 1, 1], [], []>} : vector<16x16xbf16>, vector<16x16xbf16>, vector<16x16xf32> -> vector<16x16xf32>
    %21 = arith.addf %19, %20 : vector<16x16xf32>
    %22 = arith.truncf %16 : vector<16x16xf32> to vector<16x16xbf16>
    %23 = arith.extf %22 : vector<16x16xbf16> to vector<16x16xf32>
    %24 = arith.subf %16, %23 : vector<16x16xf32>
    %25 = arith.truncf %24 : vector<16x16xf32> to vector<16x16xbf16>
    %26 = arith.extf %25 : vector<16x16xbf16> to vector<16x16xf32>
    %27 = arith.subf %24, %26 : vector<16x16xf32>
    %28 = arith.truncf %27 : vector<16x16xf32> to vector<16x16xbf16>
    %cst_14 = arith.constant dense<0.000000e+00> : vector<16x32xf32>
    %29 = tpu.matmul %22, %4, %cst_14 {dimension_numbers = #tpu.dot_dimension_numbers<[1], [0], [0], [1], [0, 0, 1, 1], [], []>} : vector<16x16xbf16>, vector<16x32xbf16>, vector<16x32xf32> -> vector<16x32xf32>
    %cst_15 = arith.constant dense<0.000000e+00> : vector<16x32xf32>
    %30 = tpu.matmul %25, %4, %cst_15 {dimension_numbers = #tpu.dot_dimension_numbers<[1], [0], [0], [1], [0, 0, 1, 1], [], []>} : vector<16x16xbf16>, vector<16x32xbf16>, vector<16x32xf32> -> vector<16x32xf32>
    %31 = arith.addf %29, %30 : vector<16x32xf32>
    %cst_16 = arith.constant dense<0.000000e+00> : vector<16x32xf32>
    %32 = tpu.matmul %28, %4, %cst_16 {dimension_numbers = #tpu.dot_dimension_numbers<[1], [0], [0], [1], [0, 0, 1, 1], [], []>} : vector<16x16xbf16>, vector<16x32xbf16>, vector<16x32xf32> -> vector<16x32xf32>
    %33 = arith.addf %31, %32 : vector<16x32xf32>
    %34 = arith.truncf %21 : vector<16x16xf32> to vector<16x16xbf16>
    %35 = arith.extf %34 : vector<16x16xbf16> to vector<16x16xf32>
    %36 = arith.subf %21, %35 : vector<16x16xf32>
    %37 = arith.truncf %36 : vector<16x16xf32> to vector<16x16xbf16>
    %38 = arith.extf %37 : vector<16x16xbf16> to vector<16x16xf32>
    %39 = arith.subf %36, %38 : vector<16x16xf32>
    %40 = arith.truncf %39 : vector<16x16xf32> to vector<16x16xbf16>
    %cst_17 = arith.constant dense<0.000000e+00> : vector<32x16xf32>
    %41 = tpu.matmul %2, %34, %cst_17 {dimension_numbers = #tpu.dot_dimension_numbers<[1], [0], [0], [1], [0, 0, 1, 1], [], []>} : vector<32x16xbf16>, vector<16x16xbf16>, vector<32x16xf32> -> vector<32x16xf32>
    %cst_18 = arith.constant dense<0.000000e+00> : vector<32x16xf32>
    %42 = tpu.matmul %2, %37, %cst_18 {dimension_numbers = #tpu.dot_dimension_numbers<[1], [0], [0], [1], [0, 0, 1, 1], [], []>} : vector<32x16xbf16>, vector<16x16xbf16>, vector<32x16xf32> -> vector<32x16xf32>
    %43 = arith.addf %41, %42 : vector<32x16xf32>
    %cst_19 = arith.constant dense<0.000000e+00> : vector<32x16xf32>
    %44 = tpu.matmul %2, %40, %cst_19 {dimension_numbers = #tpu.dot_dimension_numbers<[1], [0], [0], [1], [0, 0, 1, 1], [], []>} : vector<32x16xbf16>, vector<16x16xbf16>, vector<32x16xf32> -> vector<32x16xf32>
    %45 = arith.addf %43, %44 : vector<32x16xf32>
    %46 = vector.extract_strided_slice %33 {offsets = [0, 0], sizes = [16, 16], strides = [1, 1]} : vector<16x32xf32> to vector<16x16xf32>
    %cst_20 = arith.constant 6.600000e-01 : f32
    %47 = vector.broadcast %cst_20 : f32 to vector<16x16xf32>
    %48 = arith.addf %46, %47 : vector<16x16xf32>
    %49 = vector.extract_strided_slice %33 {offsets = [0, 16], sizes = [16, 16], strides = [1, 1]} : vector<16x32xf32> to vector<16x16xf32>
    %cst_21 = arith.constant 6.600000e-01 : f32
    %50 = vector.broadcast %cst_21 : f32 to vector<16x16xf32>
    %51 = arith.addf %49, %50 : vector<16x16xf32>
    %52 = vector.extract_strided_slice %45 {offsets = [0, 0], sizes = [16, 16], strides = [1, 1]} : vector<32x16xf32> to vector<16x16xf32>
    %cst_22 = arith.constant 6.600000e-01 : f32
    %53 = vector.broadcast %cst_22 : f32 to vector<16x16xf32>
    %54 = arith.addf %52, %53 : vector<16x16xf32>
    %55 = vector.extract_strided_slice %45 {offsets = [16, 0], sizes = [16, 16], strides = [1, 1]} : vector<32x16xf32> to vector<16x16xf32>
    %cst_23 = arith.constant 6.600000e-01 : f32
    %56 = vector.broadcast %cst_23 : f32 to vector<16x16xf32>
    %57 = arith.addf %55, %56 : vector<16x16xf32>
    %58 = math.log %48 : vector<16x16xf32>
    %59 = math.log %51 : vector<16x16xf32>
    %60 = arith.subf %58, %59 : vector<16x16xf32>
    %61 = math.log %54 : vector<16x16xf32>
    %62 = math.log %57 : vector<16x16xf32>
    %63 = arith.subf %61, %62 : vector<16x16xf32>
    %64 = arith.mulf %60, %60 : vector<16x16xf32>
    %65 = arith.mulf %63, %63 : vector<16x16xf32>
    %66 = arith.addf %64, %65 : vector<16x16xf32>
    %67 = math.sqrt %66 : vector<16x16xf32>
    %c0_24 = arith.constant 0 : index
    %c0_25 = arith.constant 0 : index
    %68 = vector.load %arg6[%c0_24, %c0_25] : memref<16x16xf32, #tpu.memory_space<vmem>>, vector<16x16xf32>
    tpu.vector_store %arg6[%c0_24, %c0_25], %67 {strides = array<i32>} : memref<16x16xf32, #tpu.memory_space<vmem>>, vector<16x16xf32>,
    return
  }
  func.func @transform_0(%arg0: i32) -> (i32, i32) {
    %c0_i32 = arith.constant 0 : i32
    %c0_i32_0 = arith.constant 0 : i32
    %c0_i32_1 = arith.constant 0 : i32
    return %c0_i32, %c0_i32_0 : i32, i32
  }
  func.func @transform_1(%arg0: i32) -> (i32, i32) {
    %c0_i32 = arith.constant 0 : i32
    %c0_i32_0 = arith.constant 0 : i32
    %c0_i32_1 = arith.constant 0 : i32
    return %c0_i32, %c0_i32_0 : i32, i32
  }
  func.func @transform_2(%arg0: i32) -> (i32, i32) {
    %c0_i32 = arith.constant 0 : i32
    %c0_i32_0 = arith.constant 0 : i32
    %c0_i32_1 = arith.constant 0 : i32
    return %c0_i32, %c0_i32_0 : i32, i32
  }
  func.func @transform_3(%arg0: i32) -> (i32, i32) {
    %c0_i32 = arith.constant 0 : i32
    %c0_i32_0 = arith.constant 0 : i32
    %c0_i32_1 = arith.constant 0 : i32
    return %c0_i32, %c0_i32_0 : i32, i32
  }
  func.func @transform_4(%arg0: i32) -> (i32, i32) {
    %c0_i32 = arith.constant 0 : i32
    %c0_i32_0 = arith.constant 0 : i32
    return %arg0, %c0_i32 : i32, i32
  }
  func.func @transform_5(%arg0: i32) -> (i32, i32) {
    %c0_i32 = arith.constant 0 : i32
    %c0_i32_0 = arith.constant 0 : i32
    return %arg0, %c0_i32 : i32, i32
  }
}

</mosaic_0001>

<bundles_post_ra>
// kernel: tpu_custom_call.1
= control target key start
LH: loop header
LB: loop body
LE: loop exit
PB: predicated region body
PF: predicated region fallthrough
CT: control target
= control target key end

     0   :  { %s1188_s18 = smov 0   ;;  %s1271_s0 = inlined_call_operand.vmem [shape: bf16[16,16], index: 0, kind: input, shape index: {}]   ;;  %s1272_s1 = inlined_call_operand.vmem [shape: bf16[32,16], index: 1, kind: input, shape index: {}]   ;;  %s1273_s2 = inlined_call_operand.vmem [shape: bf16[16,16], index: 2, kind: input, shape index: {}]   ;;  %s1274_s3 = inlined_call_operand.vmem [shape: bf16[16,32], index: 3, kind: input, shape index: {}]   ;;  %s1275_s4 = inlined_call_operand.vmem [shape: f32[32,16], index: 4, kind: input, shape index: {}]   ;;  %s1276_s5 = inlined_call_operand.vmem [shape: f32[32,16], index: 5, kind: output, shape index: {}]  }
   0x1 LB: > { %s963_s19 = sadd.s32 4294967295, %s1153_s18   ;;  %p967_p0 = scmp.ge.s32.totalorder %s1153_s18, 1  ;;  %s1153_s18 = sphi %s1188_s18, %s15_s18  }
   0x2   : > { %p188_p1 = scmp.lt.s32.totalorder %s1153_s18, 3 }
   0x4   : > { %p189_p2 = pnand %p967_p0, %p188_p1 }
   0x5   : > { %s968_s20 = sshll.u32 (!%p189_p2), %s963_s19, 1  ;;  %v1155_v0 = vmov (!%p189_p2), 0.0   ;;  %vm1156_vm0 = vmmov (!%p189_p2), 0   ;;  %v1127_v1 = vld [vmem:[%s1273_s2] sm:$0xff] (!%p189_p2)   ;;  %vm257_vm1 = vcmask (!%p189_p2), 130048   ;;  %v1130_v50 = vld [vmem:[%s1272_s1 + $0x8] sm:$0xff] (!%p189_p2)  }
   0x6   : > { %192 = sbr.rel (%p189_p2) target bundleno = 652 (0x28c), region = 40  ;;  %1021 = vmatprep.subr.bf16.mxu0 (!%p189_p2), %v1155_v0  ;;  %p217_p3 = scmp.lt.s32.totalorder (!%p189_p2), %s968_s20, 3  ;;  %1023 = vmatprep.mubr.msk.bf16.mxu0 (!%p189_p2), %vm1156_vm0, %v1155_v0  ;;  %v1126_v10 = vld [vmem:[%s1271_s0] sm:$0xff] (!%p189_p2)  }
   0x7   : > { %1045 = vmatprep.subr.bf16.mxu1 (!%p189_p2), %v1155_v0  ;;  %1047 = vmatprep.mubr.msk.bf16.mxu1 (!%p189_p2), %vm1156_vm0, %v1155_v0  ;;  %v1128_v16 = vld [vmem:[%s1274_s3] sm:$0xff] (!%p189_p2)   ;;  %s1157_s10 = smov (!%p189_p2), 112  }
   0x8   : > { %1046 = vmatpush3.bf16.msra.mxu1 (!%p189_p2), %v1127_v1  ;;  %v1129_v24 = vld [vmem:[%s1272_s1] sm:$0xff] (!%p189_p2)  }
   0x9   : > { %1051 = vmatprep.subr.bf16.mxu1 (!%p189_p2), %v1155_v0 }
   0xd   : > { %s1278_s20 = smov (!%p217_p3, %s968_s20), 3 }
   0xe   : > { %s969_s23 = sshll.u32 %s1278_s20, 3 }
   0xf   : > { %s220_s26 = scalar_lea.vmem %s1275_s4, %s969_s23  ;;  %s226_s13 = scalar_lea.vmem %s1276_s5, %s969_s23 }
  0x10   : > { %v229_v2 = vld [vmem:[%s220_s26] sm:$0xff]  ;;  %v230_v3 = vld [vmem:[%s220_s26 + $0x8] sm:$0xff] }
  0x11   : > { %v241_v4 = vpack.c.bf16 %v230_v3, %v229_v2 }
  0x13   : > { %v242_v5 = vunpack.c.l.bf16 %v241_v4  ;;  %v243_v6 = vunpack.c.h.bf16 %v241_v4  ;;  %1048 = vmatmul.mubr.msk.bf16.vlgmr.msra.gmra.mrb[0].mxu1 %vm257_vm1, %v241_v4 }
  0x14   : > { %1052 = vmatpush3.bf16.msra.mxu1 %v1127_v1  ;;  %1053 = vmatprep.mubr.msk.bf16.mxu1 %vm1156_vm0, %v1155_v0 }
  0x15   : > { %v244_v7 = vsub.f32 %v229_v2, %v242_v5  ;;  %v245_v8 = vsub.f32 %v230_v3, %v243_v6  ;;  %1063 = vmatprep.subr.bf16.mxu1 %v1155_v0 }
  0x17   : > { %v246_v9 = vpack.c.bf16 %v245_v8, %v244_v7 }
  0x19   : > { %1022 = vmatpush3.bf16.msra.mxu0 %v246_v9  ;;  %v247_v11 = vunpack.c.l.bf16 %v246_v9  ;;  %v248_v12 = vunpack.c.h.bf16 %v246_v9 }
  0x1a   : > { %1027 = vmatprep.subr.bf16.mxu0 %v1155_v0 }
  0x1b   : > { %v249_v13 = vsub.f32 %v244_v7, %v247_v11  ;;  %v250_v14 = vsub.f32 %v245_v8, %v248_v12 }
  0x1c   : > { %1024 = vmatmul.mubr.msk.bf16.vlgmr.msra.gmra.mrb[0].mxu0 %vm257_vm1, %v1126_v10 }
  0x1d   : > { %1028 = vmatpush3.bf16.msra.mxu0 %v241_v4  ;;  %1029 = vmatprep.mubr.msk.bf16.mxu0 %vm1156_vm0, %v1155_v0  ;;  %v251_v15 = vpack.c.bf16 %v250_v14, %v249_v13 }
  0x1e   : > { %1033 = vmatprep.subr.bf16.mxu0 %v1155_v0 }
  0x1f   : > { %1054 = vmatmul.mubr.msk.bf16.vlgmr.msra.gmra.mrb[0].mxu1 %vm257_vm1, %v251_v15 }
  0x20   : > { %1065 = vmatprep.mubr.msk.bf16.mxu1 %vm1156_vm0, %v1155_v0  ;;  %1064 = vmatpush3.bf16.msra.mxu1 %v1128_v16 }
  0x28   : > { %1030 = vmatmul.mubr.msk.bf16.vlgmr.msra.gmra.mrb[0].mxu0 %vm257_vm1, %v1126_v10 }
  0x29   : > { %1034 = vmatpush3.bf16.msra.mxu0 %v251_v15  ;;  %1035 = vmatprep.mubr.msk.bf16.mxu0 %vm1156_vm0, %v1155_v0 }
  0x2a   : > { %1039 = vmatprep.subr.bf16.mxu0 %v1155_v0 }
  0x34   : > { %1036 = vmatmul.mubr.msk.bf16.vlgmr.msra.gmra.mrb[0].mxu0 %vm257_vm1, %v1126_v10 }
  0x35   : > { %1040 = vmatpush3.bf16.msra.mxu0 %v1127_v1  ;;  %1041 = vmatprep.mubr.msk.bf16.mxu0 %vm1156_vm0, %v1155_v0 }
  0x36   : > { %1057 = vmatprep.subr.bf16.mxu0 %v1155_v0 }
  0x3c   : > { %1042 = vmatmul.mubr.msk.bf16.vlgmr.msra.gmra.mrb[4].mxu0 %vm257_vm1, %v246_v9 }
  0x3d   : > { %1059 = vmatprep.mubr.msk.bf16.mxu0 %vm1156_vm0, %v1155_v0  ;;  %1058 = vmatpush3.bf16.msra.mxu0 %v1128_v16 }
  0x3e   : > { %1069 = vmatprep.subr.bf16.mxu0 %v1155_v0 }
  0xf2   : > { %v517_v17 = vpop.f32.mrb[0].mxu1 }
  0xf3   : > { %v1055_v18 = vpop.f32.mrb[1].mxu1 }
  0xf4   : > { %v520_v19 = vpop.f32.mrb[2].mxu1 }
  0xf5   : > { %v1056_v20 = vpop.f32.mrb[3].mxu1 }
 0x107   : > { %v377_v21 = vpop.f32.mrb[0].mxu0 }
 0x108   : > { %v1037_v22 = vpop.f32.mrb[1].mxu0 }
 0x109   : > { %v380_v23 = vpop.f32.mrb[2].mxu0 }
 0x10a   : > { %v526_v25 = vpack.c.bf16 %v380_v23, %v377_v21  ;;  %v1038_v26 = vpop.f32.mrb[3].mxu0 }
 0x10c   : > { %v527_v27 = vunpack.c.l.bf16 %v526_v25  ;;  %v528_v28 = vunpack.c.h.bf16 %v526_v25  ;;  %1066 = vmatmul.mubr.msk.bf16.vlgmr.msra.gmra.mrb[4].mxu1 %vm257_vm1, %v526_v25 }
 0x10d   : > { %1077 = vmatprep.mubr.msk.bf16.mxu1 %vm257_vm1, %v1129_v24 }
 0x10e   : > { %v529_v29 = vsub.f32 %v377_v21, %v527_v27  ;;  %v530_v30 = vsub.f32 %v380_v23, %v528_v28 }
 0x10f   : > { %v429_v31 = vpop.f32.mrb[4].mxu0 }
 0x110   : > { %v531_v32 = vpack.c.bf16 %v530_v30, %v529_v29  ;;  %v1093_v33 = vadd.f32 %v517_v17, %v429_v31  ;;  %v1043_v34 = vpop.f32.mrb[5].mxu0 }
 0x111   : > { %v432_v35 = vpop.f32.mrb[6].mxu0 }
 0x112   : > { %v532_v36 = vunpack.c.l.bf16 %v531_v32  ;;  %v533_v37 = vunpack.c.h.bf16 %v531_v32  ;;  %1060 = vmatmul.mubr.msk.bf16.vlgmr.msra.gmra.mrb[8].mxu0 %vm257_vm1, %v531_v32  ;;  %v1094_v38 = vadd.f32 %v520_v19, %v432_v35  ;;  %v1044_v39 = vpop.f32.mrb[7].mxu0 }
 0x113   : > { %1070 = vmatpush3.bf16.msra.mxu0 %v1128_v16  ;;  %1071 = vmatprep.mubr.msk.bf16.mxu0 %vm1156_vm0, %v1155_v0 }
 0x114   : > { %v534_v40 = vsub.f32 %v529_v29, %v532_v36  ;;  %v535_v41 = vsub.f32 %v530_v30, %v533_v37  ;;  %v677_v42 = vpack.c.bf16 %v1094_v38, %v1093_v33 }
 0x116   : > { %v536_v43 = vpack.c.bf16 %v535_v41, %v534_v40  ;;  %v678_v44 = vunpack.c.l.bf16 %v677_v42  ;;  %v679_v45 = vunpack.c.h.bf16 %v677_v42 }
 0x118   : > { %v680_v46 = vsub.f32 %v1093_v33, %v678_v44  ;;  %v681_v47 = vsub.f32 %v1094_v38, %v679_v45 }
 0x11a   : > { %1072 = vmatmul.mubr.msk.bf16.vlgmr.msra.gmra.mrb[12].mxu0 %vm257_vm1, %v536_v43  ;;  %v682_v48 = vpack.c.bf16 %v681_v47, %v680_v46 }
 0x11c   : > { %v684_v49 = vunpack.c.h.bf16 %v682_v48  ;;  %1075 = vmatprep.subr.bf16.mxu1 %v682_v48  ;;  %v683_v51 = vunpack.c.l.bf16 %v682_v48 }
 0x11d   : > { %1076 = vmatpush3.bf16.msra.mxu1 %v682_v48 }
 0x11e   : > { %v686_v52 = vsub.f32 %v681_v47, %v684_v49  ;;  %1081 = vmatprep.subr.bf16.mxu1 %v677_v42  ;;  %v685_v53 = vsub.f32 %v680_v46, %v683_v51 }
 0x120   : > { %1078 = vmatmul.mubr.msk.bf16.vlgmr.msra.gmra.mrb[8].mxu1 %vm257_vm1, %v1130_v50  ;;  %v687_v54 = vpack.c.bf16 %v686_v52, %v685_v53 }
 0x121   : > { %1082 = vmatpush3.bf16.msra.mxu1 %v677_v42  ;;  %1083 = vmatprep.mubr.msk.bf16.mxu1 %vm257_vm1, %v1129_v24 }
 0x122   : > { %1087 = vmatprep.subr.bf16.mxu1 %v687_v54 }
 0x12c   : > { %1084 = vmatmul.mubr.msk.bf16.vlgmr.msra.gmra.mrb[8].mxu1 %vm257_vm1, %v1130_v50 }
 0x12d   : > { %1088 = vmatpush3.bf16.msra.mxu1 %v687_v54  ;;  %1089 = vmatprep.mubr.msk.bf16.mxu1 %vm257_vm1, %v1129_v24 }
 0x138   : > { %1090 = vmatmul.mubr.msk.bf16.vlgmr.msra.gmra.mrb[8].mxu1 %vm257_vm1, %v1130_v50 }
 0x1df   : > { %v624_v55 = vpop.f32.mrb[4].mxu1 }
 0x1e0   : > { %v1067_v56 = vpop.f32.mrb[5].mxu1 }
 0x1e1   : > { %v627_v57 = vpop.f32.mrb[6].mxu1 }
 0x1e2   : > { %v1068_v58 = vpop.f32.mrb[7].mxu1 }
 0x1e5   : > { %v580_v59 = vpop.f32.mrb[8].mxu0 }
 0x1e6   : > { %v625_v60 = vadd.f32 %v624_v55, %v580_v59  ;;  %v1061_v61 = vpop.f32.mrb[9].mxu0 }
 0x1e7   : > { %v583_v62 = vpop.f32.mrb[10].mxu0 }
 0x1e8   : > { %v628_v63 = vadd.f32 %v627_v57, %v583_v62  ;;  %v1062_v0 = vpop.f32.mrb[11].mxu0 }
 0x1ed   : > { %v668_v1 = vpop.f32.mrb[12].mxu0 }
 0x1ee   : > { %v675_v2 = vadd.f32 %v668_v1, %v625_v60  ;;  %v1073_v3 = vpop.f32.mrb[13].mxu0 }
 0x1ef   : > { %v671_v4 = vpop.f32.mrb[14].mxu0 }
 0x1f0   : > { %v855_v5 = vadd.f32 0.66, %v675_v2  ;;  %v676_v6 = vadd.f32 %v671_v4, %v628_v63  ;;  %v1074_v7 = vpop.f32.mrb[15].mxu0 }
 0x1f2   : > { %1131 = vlog2.f32 %v855_v5  ;;  %v856_v8 = vadd.f32 0.66, %v676_v6 }
 0x1f4   : > { %1133 = vlog2.f32 %v856_v8 }
 0x1fc   : > { %v1132_v9 = vpop.eup %1131 }
 0x1fd   : > { %v862_v10 = vmul.f32 0.6931472, %v1132_v9 }
 0x1fe   : > { %v1134_v11 = vpop.eup %1133 }
 0x1ff   : > { %867 = vrot.lane.b32.xlu0 %v862_v10, %s1157_s10  ;;  %v864_v12 = vmul.f32 0.6931472, %v1134_v11 }
 0x203   : > { %869 = vrot.lane.b32.xlu0 %v864_v12, %s1157_s10 }
 0x20b   : > { %v1091_v13 = vpop.f32.mrb[8].mxu1 }
 0x20c   : > { %v859_v14 = vadd.f32 0.66, %v1091_v13  ;;  %v836_v15 = vpop.f32.mrb[9].mxu1 }
 0x20d   : > { %v857_v16 = vadd.f32 0.66, %v836_v15  ;;  %v1092_v17 = vpop.f32.mrb[10].mxu1 }
 0x20e   : > { %1135 = vlog2.f32 %v859_v14  ;;  %v860_v18 = vadd.f32 0.66, %v1092_v17  ;;  %v839_v19 = vpop.f32.mrb[11].mxu1 }
 0x20f   : > { %1137 = vlog2.f32 %v857_v16  ;;  %v858_v20 = vadd.f32 0.66, %v839_v19 }
 0x210   : > { %1139 = vlog2.f32 %v860_v18 }
 0x211   : > { %1141 = vlog2.f32 %v858_v20 }
 0x218   : > { %v1136_v21 = vpop.eup %1135 }
 0x219   : > { %v1138_v22 = vpop.eup %1137  ;;  %v880_v23 = vmul.f32 0.6931472, %v1136_v21 }
 0x21a   : > { %v1140_v24 = vpop.eup %1139  ;;  %v876_v25 = vmul.f32 0.6931472, %v1138_v22 }
 0x21b   : > { %v1142_v26 = vpop.eup %1141  ;;  %v882_v27 = vmul.f32 0.6931472, %v1140_v24 }
 0x21c   : > { %v878_v28 = vmul.f32 0.6931472, %v1142_v26  ;;  %v883_v29 = vsub.f32 %v876_v25, %v880_v23 }
 0x21e   : > { %v884_v30 = vsub.f32 %v878_v28, %v882_v27  ;;  %v887_v33 = vmul.f32 %v883_v29, %v883_v29 }
 0x220   : > { %v888_v38 = vmul.f32 %v884_v30, %v884_v30 }
 0x271   : > { %v868_v31 = vpop.permute.xlu0 %867 }
 0x272   : > { %v873_v32 = vsub.f32 %v862_v10, %v868_v31 }
 0x274   : > { %v885_v34 = vmul.f32 %v873_v32, %v873_v32 }
 0x275   : > { %v870_v35 = vpop.permute.xlu0 %869 }
 0x276   : > { %v889_v36 = vadd.f32 %v887_v33, %v885_v34  ;;  %v874_v37 = vsub.f32 %v864_v12, %v870_v35 }
 0x278   : > { %1143 = vrsqrt.f32 %v889_v36  ;;  %v886_v39 = vmul.f32 %v874_v37, %v874_v37  ;;  %vm893_vm2 = vcmp.eq.f32.partialorder %v889_v36, inf  ;;  %v896_v43 = vand.u32 2147483648, %v889_v36 }
 0x279   : > { %vm895_vm3 = vcmp.eq.f32.partialorder %v889_v36, 0.0 }
 0x27a   : > { %v890_v40 = vadd.f32 %v888_v38, %v886_v39 }
 0x27c   : > { %1145 = vrsqrt.f32 %v890_v40  ;;  %vm900_vm4 = vcmp.eq.f32.partialorder %v890_v40, inf  ;;  %v903_v48 = vand.u32 2147483648, %v890_v40  ;;  %vm902_vm5 = vcmp.eq.f32.partialorder %v890_v40, 0.0 }
 0x282   : > { %v1144_v41 = vpop.eup %1143 }
 0x283   : > { %v892_v42 = vmul.f32 %v1144_v41, %v889_v36 }
 0x285   : > { %v894_v44 = vsel %vm893_vm2, %v889_v36, %v892_v42 }
 0x286   : > { %v897_v45 = vsel %vm895_vm3, %v896_v43, %v894_v44  ;;  %v1146_v46 = vpop.eup %1145 }
 0x287   : > { %905 = vst.msk [vmem:[%s226_s13] sm:$0xff] %vm257_vm1, %v897_v45  ;;  %v899_v47 = vmul.f32 %v1146_v46, %v890_v40 }
 0x289   : > { %v901_v49 = vsel %vm900_vm4, %v890_v40, %v899_v47 }
 0x28a   : > { %v904_v50 = vsel %vm902_vm5, %v903_v48, %v901_v49 }
 0x28b   : > { %906 = vst.msk [vmem:[%s226_s13 + $0x8] sm:$0xff] %vm257_vm1, %v904_v50 }
 0x28c PF: > { %s15_s18 = sadd.s32 1, %s1153_s18  }
 0x28d   : > { %p12_p4 = scmp.ge.s32.totalorder %s15_s18, 4  }
 0x28f   :  { %14 = sbr.rel (!%p12_p4) target bundleno = 1 (0x1), region = 70 }

// kernel: tpu_custom_call.1
= control target key start
LH: loop header
LB: loop body
LE: loop exit
PB: predicated region body
PF: predicated region fallthrough
CT: control target
= control target key end

     0   :  { %s1188_s18 = smov 0   ;;  %s1271_s0 = inlined_call_operand.vmem [shape: bf16[16,16], index: 0, kind: input, shape index: {}]   ;;  %s1272_s1 = inlined_call_operand.vmem [shape: bf16[32,16], index: 1, kind: input, shape index: {}]   ;;  %s1273_s2 = inlined_call_operand.vmem [shape: bf16[16,16], index: 2, kind: input, shape index: {}]   ;;  %s1274_s3 = inlined_call_operand.vmem [shape: bf16[16,32], index: 3, kind: input, shape index: {}]   ;;  %s1275_s4 = inlined_call_operand.vmem [shape: f32[32,16], index: 4, kind: input, shape index: {}]   ;;  %s1276_s5 = inlined_call_operand.vmem [shape: f32[32,16], index: 5, kind: output, shape index: {}]  }
   0x1 LB: > { %s963_s19 = sadd.s32 4294967295, %s1153_s18   ;;  %p967_p0 = scmp.ge.s32.totalorder %s1153_s18, 1  ;;  %s1153_s18 = sphi %s1188_s18, %s15_s18  }
   0x2   : > { %p188_p1 = scmp.lt.s32.totalorder %s1153_s18, 3 }
   0x4   : > { %p189_p2 = pnand %p967_p0, %p188_p1 }
   0x5   : > { %s968_s20 = sshll.u32 (!%p189_p2), %s963_s19, 1  ;;  %v1155_v0 = vmov (!%p189_p2), 0.0   ;;  %vm1156_vm0 = vmmov (!%p189_p2), 0   ;;  %v1127_v1 = vld [vmem:[%s1273_s2] sm:$0xff] (!%p189_p2)   ;;  %vm257_vm1 = vcmask (!%p189_p2), 130048   ;;  %v1130_v50 = vld [vmem:[%s1272_s1 + $0x8] sm:$0xff] (!%p189_p2)  }
   0x6   : > { %192 = sbr.rel (%p189_p2) target bundleno = 652 (0x28c), region = 40  ;;  %1021 = vmatprep.subr.bf16.mxu0 (!%p189_p2), %v1155_v0  ;;  %p217_p3 = scmp.lt.s32.totalorder (!%p189_p2), %s968_s20, 3  ;;  %1023 = vmatprep.mubr.msk.bf16.mxu0 (!%p189_p2), %vm1156_vm0, %v1155_v0  ;;  %v1126_v10 = vld [vmem:[%s1271_s0] sm:$0xff] (!%p189_p2)  }
   0x7   : > { %1045 = vmatprep.subr.bf16.mxu1 (!%p189_p2), %v1155_v0  ;;  %1047 = vmatprep.mubr.msk.bf16.mxu1 (!%p189_p2), %vm1156_vm0, %v1155_v0  ;;  %v1128_v16 = vld [vmem:[%s1274_s3] sm:$0xff] (!%p189_p2)   ;;  %s1157_s10 = smov (!%p189_p2), 112  }
   0x8   : > { %1046 = vmatpush3.bf16.msra.mxu1 (!%p189_p2), %v1127_v1  ;;  %v1129_v24 = vld [vmem:[%s1272_s1] sm:$0xff] (!%p189_p2)  }
   0x9   : > { %1051 = vmatprep.subr.bf16.mxu1 (!%p189_p2), %v1155_v0 }
   0xd   : > { %s1278_s20 = smov (!%p217_p3, %s968_s20), 3 }
   0xe   : > { %s969_s23 = sshll.u32 %s1278_s20, 3 }
   0xf   : > { %s220_s26 = scalar_lea.vmem %s1275_s4, %s969_s23  ;;  %s226_s13 = scalar_lea.vmem %s1276_s5, %s969_s23 }
  0x10   : > { %v229_v2 = vld [vmem:[%s220_s26] sm:$0xff]  ;;  %v230_v3 = vld [vmem:[%s220_s26 + $0x8] sm:$0xff] }
  0x11   : > { %v241_v4 = vpack.c.bf16 %v230_v3, %v229_v2 }
  0x13   : > { %v242_v5 = vunpack.c.l.bf16 %v241_v4  ;;  %v243_v6 = vunpack.c.h.bf16 %v241_v4  ;;  %1048 = vmatmul.mubr.msk.bf16.vlgmr.msra.gmra.mrb[0].mxu1 %vm257_vm1, %v241_v4 }
  0x14   : > { %1052 = vmatpush3.bf16.msra.mxu1 %v1127_v1  ;;  %1053 = vmatprep.mubr.msk.bf16.mxu1 %vm1156_vm0, %v1155_v0 }
  0x15   : > { %v244_v7 = vsub.f32 %v229_v2, %v242_v5  ;;  %v245_v8 = vsub.f32 %v230_v3, %v243_v6  ;;  %1063 = vmatprep.subr.bf16.mxu1 %v1155_v0 }
  0x17   : > { %v246_v9 = vpack.c.bf16 %v245_v8, %v244_v7 }
  0x19   : > { %1022 = vmatpush3.bf16.msra.mxu0 %v246_v9  ;;  %v247_v11 = vunpack.c.l.bf16 %v246_v9  ;;  %v248_v12 = vunpack.c.h.bf16 %v246_v9 }
  0x1a   : > { %1027 = vmatprep.subr.bf16.mxu0 %v1155_v0 }
  0x1b   : > { %v249_v13 = vsub.f32 %v244_v7, %v247_v11  ;;  %v250_v14 = vsub.f32 %v245_v8, %v248_v12 }
  0x1c   : > { %1024 = vmatmul.mubr.msk.bf16.vlgmr.msra.gmra.mrb[0].mxu0 %vm257_vm1, %v1126_v10 }
  0x1d   : > { %1028 = vmatpush3.bf16.msra.mxu0 %v241_v4  ;;  %1029 = vmatprep.mubr.msk.bf16.mxu0 %vm1156_vm0, %v1155_v0  ;;  %v251_v15 = vpack.c.bf16 %v250_v14, %v249_v13 }
  0x1e   : > { %1033 = vmatprep.subr.bf16.mxu0 %v1155_v0 }
  0x1f   : > { %1054 = vmatmul.mubr.msk.bf16.vlgmr.msra.gmra.mrb[0].mxu1 %vm257_vm1, %v251_v15 }
  0x20   : > { %1065 = vmatprep.mubr.msk.bf16.mxu1 %vm1156_vm0, %v1155_v0  ;;  %1064 = vmatpush3.bf16.msra.mxu1 %v1128_v16 }
  0x28   : > { %1030 = vmatmul.mubr.msk.bf16.vlgmr.msra.gmra.mrb[0].mxu0 %vm257_vm1, %v1126_v10 }
  0x29   : > { %1034 = vmatpush3.bf16.msra.mxu0 %v251_v15  ;;  %1035 = vmatprep.mubr.msk.bf16.mxu0 %vm1156_vm0, %v1155_v0 }
  0x2a   : > { %1039 = vmatprep.subr.bf16.mxu0 %v1155_v0 }
  0x34   : > { %1036 = vmatmul.mubr.msk.bf16.vlgmr.msra.gmra.mrb[0].mxu0 %vm257_vm1, %v1126_v10 }
  0x35   : > { %1040 = vmatpush3.bf16.msra.mxu0 %v1127_v1  ;;  %1041 = vmatprep.mubr.msk.bf16.mxu0 %vm1156_vm0, %v1155_v0 }
  0x36   : > { %1057 = vmatprep.subr.bf16.mxu0 %v1155_v0 }
  0x3c   : > { %1042 = vmatmul.mubr.msk.bf16.vlgmr.msra.gmra.mrb[4].mxu0 %vm257_vm1, %v246_v9 }
  0x3d   : > { %1059 = vmatprep.mubr.msk.bf16.mxu0 %vm1156_vm0, %v1155_v0  ;;  %1058 = vmatpush3.bf16.msra.mxu0 %v1128_v16 }
  0x3e   : > { %1069 = vmatprep.subr.bf16.mxu0 %v1155_v0 }
  0xf2   : > { %v517_v17 = vpop.f32.mrb[0].mxu1 }
  0xf3   : > { %v1055_v18 = vpop.f32.mrb[1].mxu1 }
  0xf4   : > { %v520_v19 = vpop.f32.mrb[2].mxu1 }
  0xf5   : > { %v1056_v20 = vpop.f32.mrb[3].mxu1 }
 0x107   : > { %v377_v21 = vpop.f32.mrb[0].mxu0 }
 0x108   : > { %v1037_v22 = vpop.f32.mrb[1].mxu0 }
 0x109   : > { %v380_v23 = vpop.f32.mrb[2].mxu0 }
 0x10a   : > { %v526_v25 = vpack.c.bf16 %v380_v23, %v377_v21  ;;  %v1038_v26 = vpop.f32.mrb[3].mxu0 }
 0x10c   : > { %v527_v27 = vunpack.c.l.bf16 %v526_v25  ;;  %v528_v28 = vunpack.c.h.bf16 %v526_v25  ;;  %1066 = vmatmul.mubr.msk.bf16.vlgmr.msra.gmra.mrb[4].mxu1 %vm257_vm1, %v526_v25 }
 0x10d   : > { %1077 = vmatprep.mubr.msk.bf16.mxu1 %vm257_vm1, %v1129_v24 }
 0x10e   : > { %v529_v29 = vsub.f32 %v377_v21, %v527_v27  ;;  %v530_v30 = vsub.f32 %v380_v23, %v528_v28 }
 0x10f   : > { %v429_v31 = vpop.f32.mrb[4].mxu0 }
 0x110   : > { %v531_v32 = vpack.c.bf16 %v530_v30, %v529_v29  ;;  %v1093_v33 = vadd.f32 %v517_v17, %v429_v31  ;;  %v1043_v34 = vpop.f32.mrb[5].mxu0 }
 0x111   : > { %v432_v35 = vpop.f32.mrb[6].mxu0 }
 0x112   : > { %v532_v36 = vunpack.c.l.bf16 %v531_v32  ;;  %v533_v37 = vunpack.c.h.bf16 %v531_v32  ;;  %1060 = vmatmul.mubr.msk.bf16.vlgmr.msra.gmra.mrb[8].mxu0 %vm257_vm1, %v531_v32  ;;  %v1094_v38 = vadd.f32 %v520_v19, %v432_v35  ;;  %v1044_v39 = vpop.f32.mrb[7].mxu0 }
 0x113   : > { %1070 = vmatpush3.bf16.msra.mxu0 %v1128_v16  ;;  %1071 = vmatprep.mubr.msk.bf16.mxu0 %vm1156_vm0, %v1155_v0 }
 0x114   : > { %v534_v40 = vsub.f32 %v529_v29, %v532_v36  ;;  %v535_v41 = vsub.f32 %v530_v30, %v533_v37  ;;  %v677_v42 = vpack.c.bf16 %v1094_v38, %v1093_v33 }
 0x116   : > { %v536_v43 = vpack.c.bf16 %v535_v41, %v534_v40  ;;  %v678_v44 = vunpack.c.l.bf16 %v677_v42  ;;  %v679_v45 = vunpack.c.h.bf16 %v677_v42 }
 0x118   : > { %v680_v46 = vsub.f32 %v1093_v33, %v678_v44  ;;  %v681_v47 = vsub.f32 %v1094_v38, %v679_v45 }
 0x11a   : > { %1072 = vmatmul.mubr.msk.bf16.vlgmr.msra.gmra.mrb[12].mxu0 %vm257_vm1, %v536_v43  ;;  %v682_v48 = vpack.c.bf16 %v681_v47, %v680_v46 }
 0x11c   : > { %v684_v49 = vunpack.c.h.bf16 %v682_v48  ;;  %1075 = vmatprep.subr.bf16.mxu1 %v682_v48  ;;  %v683_v51 = vunpack.c.l.bf16 %v682_v48 }
 0x11d   : > { %1076 = vmatpush3.bf16.msra.mxu1 %v682_v48 }
 0x11e   : > { %v686_v52 = vsub.f32 %v681_v47, %v684_v49  ;;  %1081 = vmatprep.subr.bf16.mxu1 %v677_v42  ;;  %v685_v53 = vsub.f32 %v680_v46, %v683_v51 }
 0x120   : > { %1078 = vmatmul.mubr.msk.bf16.vlgmr.msra.gmra.mrb[8].mxu1 %vm257_vm1, %v1130_v50  ;;  %v687_v54 = vpack.c.bf16 %v686_v52, %v685_v53 }
 0x121   : > { %1082 = vmatpush3.bf16.msra.mxu1 %v677_v42  ;;  %1083 = vmatprep.mubr.msk.bf16.mxu1 %vm257_vm1, %v1129_v24 }
 0x122   : > { %1087 = vmatprep.subr.bf16.mxu1 %v687_v54 }
 0x12c   : > { %1084 = vmatmul.mubr.msk.bf16.vlgmr.msra.gmra.mrb[8].mxu1 %vm257_vm1, %v1130_v50 }
 0x12d   : > { %1088 = vmatpush3.bf16.msra.mxu1 %v687_v54  ;;  %1089 = vmatprep.mubr.msk.bf16.mxu1 %vm257_vm1, %v1129_v24 }
 0x138   : > { %1090 = vmatmul.mubr.msk.bf16.vlgmr.msra.gmra.mrb[8].mxu1 %vm257_vm1, %v1130_v50 }
 0x1df   : > { %v624_v55 = vpop.f32.mrb[4].mxu1 }
 0x1e0   : > { %v1067_v56 = vpop.f32.mrb[5].mxu1 }
 0x1e1   : > { %v627_v57 = vpop.f32.mrb[6].mxu1 }
 0x1e2   : > { %v1068_v58 = vpop.f32.mrb[7].mxu1 }
 0x1e5   : > { %v580_v59 = vpop.f32.mrb[8].mxu0 }
 0x1e6   : > { %v625_v60 = vadd.f32 %v624_v55, %v580_v59  ;;  %v1061_v61 = vpop.f32.mrb[9].mxu0 }
 0x1e7   : > { %v583_v62 = vpop.f32.mrb[10].mxu0 }
 0x1e8   : > { %v628_v63 = vadd.f32 %v627_v57, %v583_v62  ;;  %v1062_v0 = vpop.f32.mrb[11].mxu0 }
 0x1ed   : > { %v668_v1 = vpop.f32.mrb[12].mxu0 }
 0x1ee   : > { %v675_v2 = vadd.f32 %v668_v1, %v625_v60  ;;  %v1073_v3 = vpop.f32.mrb[13].mxu0 }
 0x1ef   : > { %v671_v4 = vpop.f32.mrb[14].mxu0 }
 0x1f0   : > { %v855_v5 = vadd.f32 0.66, %v675_v2  ;;  %v676_v6 = vadd.f32 %v671_v4, %v628_v63  ;;  %v1074_v7 = vpop.f32.mrb[15].mxu0 }
 0x1f2   : > { %1131 = vlog2.f32 %v855_v5  ;;  %v856_v8 = vadd.f32 0.66, %v676_v6 }
 0x1f4   : > { %1133 = vlog2.f32 %v856_v8 }
 0x1fc   : > { %v1132_v9 = vpop.eup %1131 }
 0x1fd   : > { %v862_v10 = vmul.f32 0.6931472, %v1132_v9 }
 0x1fe   : > { %v1134_v11 = vpop.eup %1133 }
 0x1ff   : > { %867 = vrot.lane.b32.xlu0 %v862_v10, %s1157_s10  ;;  %v864_v12 = vmul.f32 0.6931472, %v1134_v11 }
 0x203   : > { %869 = vrot.lane.b32.xlu0 %v864_v12, %s1157_s10 }
 0x20b   : > { %v1091_v13 = vpop.f32.mrb[8].mxu1 }
 0x20c   : > { %v859_v14 = vadd.f32 0.66, %v1091_v13  ;;  %v836_v15 = vpop.f32.mrb[9].mxu1 }
 0x20d   : > { %v857_v16 = vadd.f32 0.66, %v836_v15  ;;  %v1092_v17 = vpop.f32.mrb[10].mxu1 }
 0x20e   : > { %1135 = vlog2.f32 %v859_v14  ;;  %v860_v18 = vadd.f32 0.66, %v1092_v17  ;;  %v839_v19 = vpop.f32.mrb[11].mxu1 }
 0x20f   : > { %1137 = vlog2.f32 %v857_v16  ;;  %v858_v20 = vadd.f32 0.66, %v839_v19 }
 0x210   : > { %1139 = vlog2.f32 %v860_v18 }
 0x211   : > { %1141 = vlog2.f32 %v858_v20 }
 0x218   : > { %v1136_v21 = vpop.eup %1135 }
 0x219   : > { %v1138_v22 = vpop.eup %1137  ;;  %v880_v23 = vmul.f32 0.6931472, %v1136_v21 }
 0x21a   : > { %v1140_v24 = vpop.eup %1139  ;;  %v876_v25 = vmul.f32 0.6931472, %v1138_v22 }
 0x21b   : > { %v1142_v26 = vpop.eup %1141  ;;  %v882_v27 = vmul.f32 0.6931472, %v1140_v24 }
 0x21c   : > { %v878_v28 = vmul.f32 0.6931472, %v1142_v26  ;;  %v883_v29 = vsub.f32 %v876_v25, %v880_v23 }
 0x21e   : > { %v884_v30 = vsub.f32 %v878_v28, %v882_v27  ;;  %v887_v33 = vmul.f32 %v883_v29, %v883_v29 }
 0x220   : > { %v888_v38 = vmul.f32 %v884_v30, %v884_v30 }
 0x271   : > { %v868_v31 = vpop.permute.xlu0 %867 }
 0x272   : > { %v873_v32 = vsub.f32 %v862_v10, %v868_v31 }
 0x274   : > { %v885_v34 = vmul.f32 %v873_v32, %v873_v32 }
 0x275   : > { %v870_v35 = vpop.permute.xlu0 %869 }
 0x276   : > { %v889_v36 = vadd.f32 %v887_v33, %v885_v34  ;;  %v874_v37 = vsub.f32 %v864_v12, %v870_v35 }
 0x278   : > { %1143 = vrsqrt.f32 %v889_v36  ;;  %v886_v39 = vmul.f32 %v874_v37, %v874_v37  ;;  %vm893_vm2 = vcmp.eq.f32.partialorder %v889_v36, inf  ;;  %v896_v43 = vand.u32 2147483648, %v889_v36 }
 0x279   : > { %vm895_vm3 = vcmp.eq.f32.partialorder %v889_v36, 0.0 }
 0x27a   : > { %v890_v40 = vadd.f32 %v888_v38, %v886_v39 }
 0x27c   : > { %1145 = vrsqrt.f32 %v890_v40  ;;  %vm900_vm4 = vcmp.eq.f32.partialorder %v890_v40, inf  ;;  %v903_v48 = vand.u32 2147483648, %v890_v40  ;;  %vm902_vm5 = vcmp.eq.f32.partialorder %v890_v40, 0.0 }
 0x282   : > { %v1144_v41 = vpop.eup %1143 }
 0x283   : > { %v892_v42 = vmul.f32 %v1144_v41, %v889_v36 }
 0x285   : > { %v894_v44 = vsel %vm893_vm2, %v889_v36, %v892_v42 }
 0x286   : > { %v897_v45 = vsel %vm895_vm3, %v896_v43, %v894_v44  ;;  %v1146_v46 = vpop.eup %1145 }
 0x287   : > { %905 = vst.msk [vmem:[%s226_s13] sm:$0xff] %vm257_vm1, %v897_v45  ;;  %v899_v47 = vmul.f32 %v1146_v46, %v890_v40 }
 0x289   : > { %v901_v49 = vsel %vm900_vm4, %v890_v40, %v899_v47 }
 0x28a   : > { %v904_v50 = vsel %vm902_vm5, %v903_v48, %v901_v49 }
 0x28b   : > { %906 = vst.msk [vmem:[%s226_s13 + $0x8] sm:$0xff] %vm257_vm1, %v904_v50 }
 0x28c PF: > { %s15_s18 = sadd.s32 1, %s1153_s18  }
 0x28d   : > { %p12_p4 = scmp.ge.s32.totalorder %s15_s18, 4  }
 0x28f   :  { %14 = sbr.rel (!%p12_p4) target bundleno = 1 (0x1), region = 70 }

</bundles_post_ra>
